<compile_context>
chip_gen: v7x
topology: tpu7x:2x2x1
jax: 0.10.0
libtpu: 0.0.40
codegen_flags: <defaults>
</compile_context>

<pallas_src>
import jax
import jax.numpy as jnp
from jax.experimental import pallas as pl
from jax.experimental.pallas import tpu as pltpu


# ---------------------------------------------------------------------------
# Kernels
# ---------------------------------------------------------------------------
def _kron_kernel(k_ref, b_ref, x_ref, o_ref):
    """Fused graph-conv: o = relu(K @ x + b) for one lane block.

    k_ref: [CN, CN] VMEM  fused operator W^T (kron) Ahat   (grid-resident)
    b_ref: [CN, 1]  VMEM  bias column (bias[d] repeated over the N nodes)
    x_ref: [CN, LB] VMEM  feature lane block (lanes = fused batch*time)
    o_ref: [CN, LB] VMEM  output lane block
    """
    acc = jnp.dot(k_ref[...], x_ref[...], preferred_element_type=jnp.float32)
    o_ref[...] = jnp.maximum(acc + b_ref[...], 0.0).astype(o_ref.dtype)


def _mix_aggregate_kernel(a_ref, x_ref, w_ref, b_ref, o_ref):
    """Mix-then-aggregate fallback for large C*N.

    a_ref: [N, N]     VMEM  normalized adjacency (grid-resident)
    x_ref: [C, N, LB] VMEM  feature lane block
    w_ref: [C*C]      SMEM  graph-conv weight, flattened row-major
    b_ref: [C]        SMEM  graph-conv bias
    o_ref: [C, N, LB] VMEM  output lane block
    """
    C = x_ref.shape[0]
    a = a_ref[...].astype(jnp.float32)
    # TODO(synk): for C >= ~16 move the channel mix onto the MXU (W in VMEM,
    # contracted against a [C, N*LB] slab) instead of C*C VPU FMAs.
    for d in range(C):
        # Channel mix first (linearity): only ONE [N, LB] slab is live at a
        # time, instead of C aggregated slabs (which previously spilled).
        y = x_ref[0] * w_ref[d]
        for c in range(1, C):
            y = y + x_ref[c] * w_ref[c * C + d]
        agg = jnp.dot(a, y, preferred_element_type=jnp.float32)
        o_ref[d] = jnp.maximum(agg + b_ref[d], 0.0).astype(o_ref.dtype)


# ---------------------------------------------------------------------------
# Tiling / VMEM budgeting
# ---------------------------------------------------------------------------
_LANE_CANDIDATES = (2048, 1024, 512, 256, 128)
_BLOCK_VMEM_BUDGET = 20 * 1024 * 1024   # conservative: v7x scoped default is 32 MiB
_KRON_MAX_CN = 512                      # fuse W and Ahat while the operator stays tiny


def _round_up(x, m):
    return -(-x // m) * m


def _pick_lane_block(bt, rows, itemsize, block_budget_bytes):
    """Pick (lane_block, padded_bt).  rows = sublane rows per block (C*N)."""
    def padded(lb):
        return _round_up(bt, lb)

    def fits(lb):
        # double-buffered input (stream dtype) + output (f32) blocks
        return 2 * rows * lb * (itemsize + 4) <= block_budget_bytes

    def waste_ok(lb):
        # never pad tiny problems past 128 lanes; cap padding waste at 25%
        return padded(lb) - bt <= max(bt // 4, 127)

    viable = [lb for lb in _LANE_CANDIDATES if fits(lb) and waste_ok(lb)]
    if not viable:
        viable = [128]   # last resort; vmem_limit_bytes is sized to match
    # Prefer the largest block that still yields >= 8 grid steps (keeps both
    # v7x TensorCores busy and the pipeline deep), but never shrink below 512
    # lanes just to manufacture steps.
    for lb in viable:
        if padded(lb) // lb >= 8 or lb <= 512 or lb == viable[-1]:
            return lb, padded(lb)
    return viable[-1], padded(viable[-1])


def _vmem_limit_bytes(resident_bytes, in_block_bytes, out_block_bytes):
    # resident operator (counted double-buffered to be safe) + double-buffered
    # in/out blocks + headroom for compiler temporaries.
    need = 2 * resident_bytes + 2 * in_block_bytes + 2 * out_block_bytes
    need = int(need * 1.5) + (4 << 20)
    # Stay comfortably under v7x's 64 MiB physical VMEM (v5e/v6e have 128 MiB).
    return max(8 << 20, min(need, 48 << 20))


# ---------------------------------------------------------------------------
# Host-side wrappers
# ---------------------------------------------------------------------------
def _normalize_adjacency(adj):
    """DGL GraphConv(norm='both') operator: Ahat = D_in^-1/2 A^T D_out^-1/2."""
    out_deg = jnp.clip(adj.sum(axis=1), 1.0, None)   # out-degree of src nodes
    in_deg = jnp.clip(adj.sum(axis=0), 1.0, None)    # in-degree of dst nodes
    return ((in_deg[:, None] ** -0.5) * adj.T *
            (out_deg[None, :] ** -0.5)).astype(jnp.float32)


def spatio_conv_packed(h, adj, weight, bias, *, stream_dtype=jnp.float32):
    """Graph-conv + bias + ReLU on activations already in [C, N, BT] layout.

    Keep this layout across the whole ST block (relayout only at model
    boundaries) to avoid per-layer transpose passes over HBM.
    stream_dtype=jnp.bfloat16 halves HBM input bytes on v6e/v7x (f32 accumulate
    and f32 output are kept); default f32 matches the PyTorch numerics.
    """
    C, N, BT = h.shape
    CN = C * N
    a_hat = _normalize_adjacency(adj)
    weight = weight.astype(jnp.float32)
    bias = bias.astype(jnp.float32)
    itemsize = jnp.dtype(stream_dtype).itemsize

    use_kron = CN <= _KRON_MAX_CN
    resident = (itemsize * CN * CN + 4 * CN) if use_kron else 4 * N * N
    budget = max(_BLOCK_VMEM_BUDGET - 2 * resident, 4 * 1024 * 1024)
    lb, bt_pad = _pick_lane_block(BT, CN, itemsize, budget)

    h = h.astype(stream_dtype)
    if bt_pad != BT:
        h = jnp.pad(h, ((0, 0), (0, 0), (0, bt_pad - BT)))

    grid = (bt_pad // lb,)
    params = pltpu.CompilerParams(
        dimension_semantics=("parallel",),   # megacore-shardable on v7x
        vmem_limit_bytes=_vmem_limit_bytes(
            resident, itemsize * CN * lb, 4 * CN * lb),
    )

    if use_kron:
        # Fused operator: out[d*N+v, l] = sum_{c,u} W[c,d] * Ahat[v,u] * x[c*N+u, l]
        k_op = jnp.kron(weight.T, a_hat).astype(stream_dtype)     # [CN, CN]
        b_col = jnp.repeat(bias, N)[:, None]                      # [CN, 1] f32
        out2 = pl.pallas_call(
            _kron_kernel,
            out_shape=jax.ShapeDtypeStruct((CN, bt_pad), jnp.float32),
            grid_spec=pltpu.PrefetchScalarGridSpec(
                num_scalar_prefetch=0,
                grid=grid,
                in_specs=[
                    pl.BlockSpec((CN, CN), lambda q: (0, 0)),      # K resident
                    pl.BlockSpec((CN, 1), lambda q: (0, 0)),       # bias column
                    pl.BlockSpec((CN, lb), lambda q: (0, q)),      # X lane block
                ],
                out_specs=pl.BlockSpec((CN, lb), lambda q: (0, q)),
            ),
            compiler_params=params,
        )(k_op, b_col, h.reshape(CN, bt_pad))
        out = out2.reshape(C, N, bt_pad)
    else:
        out = pl.pallas_call(
            _mix_aggregate_kernel,
            out_shape=jax.ShapeDtypeStruct((C, N, bt_pad), jnp.float32),
            grid_spec=pltpu.PrefetchScalarGridSpec(
                num_scalar_prefetch=0,
                grid=grid,
                in_specs=[
                    pl.BlockSpec((N, N), lambda q: (0, 0)),         # Ahat resident
                    pl.BlockSpec((C, N, lb), lambda q: (0, 0, q)),  # X lane block
                    pl.BlockSpec((C * C,), lambda q: (0,),
                                 memory_space=pltpu.MemorySpace.SMEM),
                    pl.BlockSpec((C,), lambda q: (0,),
                                 memory_space=pltpu.MemorySpace.SMEM),
                ],
                out_specs=pl.BlockSpec((C, N, lb), lambda q: (0, 0, q)),
            ),
            compiler_params=params,
        )(a_hat.astype(stream_dtype), h, weight.reshape(-1), bias)

    if bt_pad != BT:
        out = out[:, :, :BT]
    return out


def spatio_conv_layer(x, adj, weight, bias, *, stream_dtype=jnp.float32):
    """Drop-in equivalent of PyTorch SpatioConvLayer.forward.

    x: [B, C, T, N] float; adj: [N, N]; weight: [C, C]; bias: [C].
    One host relayout each way; the module's outer torch.relu is a no-op after
    the in-kernel ReLU and is folded away (saves a full HBM read+write pass).
    """
    B, C, T, N = x.shape
    h = jnp.transpose(x, (1, 3, 0, 2)).reshape(C, N, B * T).astype(jnp.float32)
    out = spatio_conv_packed(h, adj, weight, bias, stream_dtype=stream_dtype)
    return jnp.transpose(out.reshape(C, N, B, T), (2, 0, 3, 1))


# ---------------------------------------------------------------------------
# Pure-JAX reference + self-test
# ---------------------------------------------------------------------------
def _reference(x, adj, weight, bias):
    """Pure-JAX reference of the same forward pass."""
    out_deg = jnp.clip(adj.sum(axis=1), 1.0, None)
    in_deg = jnp.clip(adj.sum(axis=0), 1.0, None)
    a_hat = (in_deg[:, None] ** -0.5) * adj.T * (out_deg[None, :] ** -0.5)
    h = jnp.transpose(x, (3, 0, 2, 1))                       # [N, B, T, C]
    agg = jnp.einsum("nm,mbtc->nbtc", a_hat, h)
    gc = jnp.maximum(jnp.einsum("nbtc,cd->nbtd", agg, weight) + bias, 0.0)
    out = jnp.transpose(gc, (1, 3, 2, 0))                    # [B, C, T, N]
    return jnp.maximum(out, 0.0)


def _make_inputs(key, B, C, T, N):
    k_x, k_a, k_w, k_b = jax.random.split(key, 4)
    x = jax.random.normal(k_x, (B, C, T, N), dtype=jnp.float32)
    # Deterministic random symmetric adjacency with a ring so no node is isolated.
    rand = jax.random.uniform(k_a, (N, N))
    adj = (rand + rand.T > 1.3).astype(jnp.float32)
    ring = jnp.roll(jnp.eye(N, dtype=jnp.float32), 1, axis=1)
    adj = jnp.clip(adj + ring + ring.T, 0.0, 1.0)
    bound = (6.0 / (C + C)) ** 0.5
    weight = jax.random.uniform(k_w, (C, C), minval=-bound, maxval=bound,
                                dtype=jnp.float32)
    bias = 0.1 * jax.random.normal(k_b, (C,), dtype=jnp.float32)
    return x, adj, weight, bias


if __name__ == "__main__":
    key = jax.random.PRNGKey(0)

    # 1) Shipped STGCN-like config -> Kronecker-fused single-matmul path.
    x, adj, weight, bias = _make_inputs(key, B=2, C=4, T=8, N=16)
    out = jax.block_until_ready(spatio_conv_layer(x, adj, weight, bias))
    ref = _reference(x, adj, weight, bias)
    assert out.shape == x.shape
    assert jnp.allclose(out, ref, atol=1e-5, rtol=1e-5)

    # 2) Wider graph (C*N > 512) -> mix-then-aggregate fallback path.
    x2, adj2, weight2, bias2 = _make_inputs(jax.random.PRNGKey(1),
                                            B=2, C=8, T=8, N=80)
    out2 = jax.block_until_ready(spatio_conv_layer(x2, adj2, weight2, bias2))
    ref2 = _reference(x2, adj2, weight2, bias2)
    assert out2.shape == x2.shape
    assert jnp.allclose(out2, ref2, atol=1e-5, rtol=1e-5)

    print("KERNEL_OK")
</pallas_src>

<mosaic_0001>
module attributes {stable_mosaic.version = 11 : i64} {
  func.func @_kron_kernel(%arg0: i32, %arg1: memref<64x64xf32, #tpu.memory_space<vmem>>, %arg2: memref<64x1xf32, #tpu.memory_space<vmem>>, %arg3: memref<64x128xf32, #tpu.memory_space<vmem>>, %arg4: memref<64x128xf32, #tpu.memory_space<vmem>>) attributes {dimension_semantics = [#tpu.dimension_semantics<parallel>], iteration_bounds = array<i64: 1>, scalar_prefetch = 0 : i64, scratch_operands = 0 : i64, tpu.core_type = #tpu.core_type<tc>, window_params = [{pipeline_mode = #tpu.pipeline_mode<synchronous>, transform_indices = @transform_0, window_bounds = array<i64: 64, 64>}, {pipeline_mode = #tpu.pipeline_mode<synchronous>, transform_indices = @transform_1, window_bounds = array<i64: 64, 1>}, {transform_indices = @transform_2, window_bounds = array<i64: 64, 128>}, {transform_indices = @transform_3, window_bounds = array<i64: 64, 128>}]} {
    %c0 = arith.constant 0 : index
    %c0_0 = arith.constant 0 : index
    %0 = vector.load %arg1[%c0, %c0_0] : memref<64x64xf32, #tpu.memory_space<vmem>>, vector<64x64xf32>
    %c0_1 = arith.constant 0 : index
    %c0_2 = arith.constant 0 : index
    %1 = vector.load %arg3[%c0_1, %c0_2] : memref<64x128xf32, #tpu.memory_space<vmem>>, vector<64x128xf32>
    %cst = arith.constant dense<0.000000e+00> : vector<64x128xf32>
    %2 = tpu.matmul %0, %1, %cst {dimension_numbers = #tpu.dot_dimension_numbers<[1], [0], [0], [1], [0, 0, 1, 1], [], []>} : vector<64x64xf32>, vector<64x128xf32>, vector<64x128xf32> -> vector<64x128xf32>
    %c0_3 = arith.constant 0 : index
    %c0_4 = arith.constant 0 : index
    %3 = vector.load %arg2[%c0_3, %c0_4] : memref<64x1xf32, #tpu.memory_space<vmem>>, vector<64x1xf32>
    %4 = vector.broadcast %3 : vector<64x1xf32> to vector<64x128xf32>
    %5 = arith.addf %2, %4 : vector<64x128xf32>
    %cst_5 = arith.constant 0.000000e+00 : f32
    %6 = vector.broadcast %cst_5 : f32 to vector<64x128xf32>
    %7 = arith.maximumf %5, %6 : vector<64x128xf32>
    %c0_6 = arith.constant 0 : index
    %c0_7 = arith.constant 0 : index
    %8 = vector.load %arg4[%c0_6, %c0_7] : memref<64x128xf32, #tpu.memory_space<vmem>>, vector<64x128xf32>
    tpu.vector_store %arg4[%c0_6, %c0_7], %7 {strides = array<i32>} : memref<64x128xf32, #tpu.memory_space<vmem>>, vector<64x128xf32>,
    return
  }
  func.func @transform_0(%arg0: i32) -> (i32, i32) {
    %c0_i32 = arith.constant 0 : i32
    %c0_i32_0 = arith.constant 0 : i32
    %c0_i32_1 = arith.constant 0 : i32
    return %c0_i32, %c0_i32_0 : i32, i32
  }
  func.func @transform_1(%arg0: i32) -> (i32, i32) {
    %c0_i32 = arith.constant 0 : i32
    %c0_i32_0 = arith.constant 0 : i32
    %c0_i32_1 = arith.constant 0 : i32
    return %c0_i32, %c0_i32_0 : i32, i32
  }
  func.func @transform_2(%arg0: i32) -> (i32, i32) {
    %c0_i32 = arith.constant 0 : i32
    %c0_i32_0 = arith.constant 0 : i32
    return %c0_i32, %arg0 : i32, i32
  }
  func.func @transform_3(%arg0: i32) -> (i32, i32) {
    %c0_i32 = arith.constant 0 : i32
    %c0_i32_0 = arith.constant 0 : i32
    return %c0_i32, %arg0 : i32, i32
  }
}

</mosaic_0001>

<bundles_post_ra>
// kernel: tpu_custom_call.1
= control target key start
LH: loop header
LB: loop body
LE: loop exit
PB: predicated region body
PF: predicated region fallthrough
CT: control target
= control target key end

     0   :  { %8 = vsyncpa [#allocation3], 0  ;;  %s498_s0 = inlined_call_operand.vmem [shape: f32[64,64], index: 0, kind: input, shape index: {}]   ;;  %s499_s1 = inlined_call_operand.vmem [shape: f32[64,1], index: 1, kind: input, shape index: {}]   ;;  %s500_s2 = inlined_call_operand.hbm [shape: f32[64,128], index: 2, kind: input, shape index: {}]   ;;  %s501_s3 = inlined_call_operand.hbm [shape: f32[64,128], index: 3, kind: output, shape index: {}]  }
   0x1   :  { %9 = vsyncpa [#allocation4], 0  ;;  %s387_s12 = smov [#allocation2]   ;;  %s339_s16 = scalar_lea.hbm %s500_s2, 1024 }
   0x2   :  { %s19_s13 = sshll.u32 %s387_s12, 4  ;;  %p340_p0 = scmp.ne.s32.totalorder %s500_s2, %s339_s16  ;;  %s20_s13 = int_to_ptr.vmem [resolvable:$true] %s19_s13 }
   0x3   :  { %p343_p1 = scmp.lt.u32.totalorder %s339_s16, %s500_s2 }
   0x5   :  { %p345_p2 = pnand %p343_p1, %p340_p0 }
   0x7   :  { %348 = shalt.err (!%p345_p2)
}
   0x8   :  { %s349_s21 = scalar_lea.vmem %s20_s13, 1024  ;;  %p354_p4 = scmp.lt.s32.totalorder %s20_s13, %s20_s13 }
   0x9   :  { %p350_p3 = scmp.ne.s32.totalorder %s20_s13, %s349_s21  ;;  %p355_p5 = scmp.lt.s32.totalorder %s349_s21, %s349_s21 }
   0xb   :  { %p356_p6 = por %p355_p5, %p354_p4 }
   0xd   :  { %p357_p7 = pnand %p356_p6, %p350_p3 }
   0xf   :  { %360 = shalt.err (!%p357_p7)
}
  0x10   :  { %s388_s22 = smov 128   ;;  %s389_s23 = smov 8  }
  0x11   :  { %25 = dma.hbm_to_vmem [thread:$0]  %s500_s2, 1024, %s20_s13, [#allocation3], %s388_s22, %s388_s22, %s389_s23  }
  0x12   :  { %383 = dma.done.wait [#allocation3], 1024  }
  0x13   :  { %384 = vsyncadd [#allocation3], 4294966272  ;;  %v390_v0 = vmov 0   ;;  %v37_v1 = vld [vmem:[#allocation2] sm:$0xff]  ;;  %v38_v2 = vld [vmem:[#allocation2 + $0x8] sm:$0xff]  ;;  %vm93_vm0 = vcmask 523264  }
  0x14   :  { %338 = vset.pattern.permute.xlu1 %v390_v0  ;;  %337 = vset.pattern.permute.xlu0 %v390_v0  ;;  %v39_v3 = vld [vmem:[#allocation2 + $0x10] sm:$0xff]  ;;  %v308_v4 = vpack.c.bf16 %v38_v2, %v37_v1  ;;  %v40_v5 = vld [vmem:[#allocation2 + $0x18] sm:$0xff]  ;;  %v41_v7 = vld [vmem:[#allocation2 + $0x20] sm:$0xff] }
  0x15   :  { %v312_v6 = vpack.c.bf16 %v40_v5, %v39_v3  ;;  %v42_v8 = vld [vmem:[#allocation2 + $0x28] sm:$0xff]  ;;  %v29_v9 = vld [vmem:[%s498_s0] sm:$0xff]  ;;  %v47_v12 = vld [vmem:[%s499_s1 + $0x10] sm:$0xff] }
  0x16   :  { %309 = vmatprep.subr.bf16.mxu0 %v308_v4  ;;  %324 = vmatprep.subr.bf16.mxu1 %v308_v4  ;;  %v33_v10 = vld [vmem:[%s498_s0 + $0x20] sm:$0xff]  ;;  %v316_v11 = vpack.c.bf16 %v42_v8, %v41_v7  ;;  %v43_v14 = vld [vmem:[#allocation2 + $0x30] sm:$0xff]  ;;  %v44_v15 = vld [vmem:[#allocation2 + $0x38] sm:$0xff] }
  0x17   :  { %311 = vmatpush3.bf16.msra.mxu0 %v308_v4  ;;  %328 = vmatpush3.bf16.msra.mxu1 %v308_v4  ;;  %v45_v13 = vld [vmem:[%s499_s1] sm:$0xff]  ;;  %v48_v16 = vld [vmem:[%s499_s1 + $0x18] sm:$0xff]  ;;  %v46_v17 = vld [vmem:[%s499_s1 + $0x8] sm:$0xff]  ;;  %v320_v18 = vpack.c.bf16 %v44_v15, %v43_v14 }
  0x18   :  { %313 = vmatprep.subr.bf16.mxu0 %v312_v6  ;;  %325 = vmatprep.subr.bf16.mxu1 %v312_v6  ;;  %v50_v19 = vld [vmem:[%s499_s1 + $0x28] sm:$0xff]  ;;  %v49_v20 = vld [vmem:[%s499_s1 + $0x20] sm:$0xff]  ;;  %v31_v23 = vld [vmem:[%s498_s0 + $0x10] sm:$0xff] }
  0x19   :  { %296 = vmatprep.mubr.msk.f32.mxu0 %vm93_vm0, %v29_v9  ;;  %302 = vmatprep.mubr.msk.f32.mxu1 %vm93_vm0, %v33_v10  ;;  %v30_v21 = vld [vmem:[%s498_s0 + $0x8] sm:$0xff]  ;;  %v35_v24 = vld [vmem:[%s498_s0 + $0x30] sm:$0xff]  ;;  %v52_v25 = vld [vmem:[%s499_s1 + $0x38] sm:$0xff] }
  0x1a   :  { %65 = vperm.xlu1 %338, %v47_v12   ;;  %55 = vperm.xlu0 %337, %v45_v13   ;;  %v34_v22 = vld [vmem:[%s498_s0 + $0x28] sm:$0xff]  ;;  %v51_v26 = vld [vmem:[%s499_s1 + $0x30] sm:$0xff]  ;;  %v32_v27 = vld [vmem:[%s498_s0 + $0x18] sm:$0xff] }
  0x1b   :  { %315 = vmatpush3.bf16.msra.mxu0 %v312_v6  ;;  %329 = vmatpush3.bf16.msra.mxu1 %v312_v6  ;;  %v36_v28 = vld [vmem:[%s498_s0 + $0x38] sm:$0xff]  ;;  %s391_s0 = smov [#allocation5]  }
  0x1c   :  { %317 = vmatprep.subr.bf16.mxu0 %v316_v11  ;;  %326 = vmatprep.subr.bf16.mxu1 %v316_v11  ;;  %s244_s1 = sshll.u32 %s391_s0, 4  ;;  %s245_s1 = int_to_ptr.vmem [resolvable:$true] %s244_s1 }
  0x1d   :  { %s361_s4 = scalar_lea.vmem %s245_s1, 1024  ;;  %p366_p9 = scmp.lt.s32.totalorder %s245_s1, %s245_s1 }
  0x1e   :  { %70 = vperm.xlu1 %338, %v48_v16   ;;  %60 = vperm.xlu0 %337, %v46_v17   ;;  %p362_p8 = scmp.ne.s32.totalorder %s245_s1, %s361_s4  ;;  %p367_p10 = scmp.lt.s32.totalorder %s361_s4, %s361_s4 }
  0x1f   :  { %319 = vmatpush3.bf16.msra.mxu0 %v316_v11  ;;  %330 = vmatpush3.bf16.msra.mxu1 %v316_v11 }
  0x20   :  { %321 = vmatprep.subr.bf16.mxu0 %v320_v18  ;;  %327 = vmatprep.subr.bf16.mxu1 %v320_v18  ;;  %p368_p11 = por %p367_p10, %p366_p9 }
  0x22   :  { %80 = vperm.xlu1 %338, %v50_v19   ;;  %75 = vperm.xlu0 %337, %v49_v20   ;;  %p369_p12 = pnand %p368_p11, %p362_p8 }
  0x23   :  { %323 = vmatpush3.bf16.msra.mxu0 %v320_v18  ;;  %331 = vmatpush3.bf16.msra.mxu1 %v320_v18 }
  0x26   :  { %297 = vmatmul.mubr.msk.f32.vlgmr.msra.gmra.mrb[0].mxu0 %vm93_vm0, %v30_v21  ;;  %303 = vmatmul.mubr.msk.f32.vlgmr.msra.gmra.mrb[0].mxu1 %vm93_vm0, %v34_v22 }
  0x27   :  { %299 = vmatprep.mubr.msk.f32.mxu0 %vm93_vm0, %v31_v23  ;;  %305 = vmatprep.mubr.msk.f32.mxu1 %vm93_vm0, %v35_v24 }
  0x28   :  { %90 = vperm.xlu1 %338, %v52_v25   ;;  %85 = vperm.xlu0 %337, %v51_v26  }
  0x2a   :  { %300 = vmatmul.mubr.msk.f32.gmra.mrb[2].mxu0 %vm93_vm0, %v32_v27  ;;  %306 = vmatmul.mubr.msk.f32.gmra.mrb[2].mxu1 %vm93_vm0, %v36_v28 }
  0x99   :  { %v66_v29 = vpop.permute.xlu1 %65  ;;  %v56_v30 = vpop.permute.xlu0 %55 }
  0x9d   :  { %v71_v31 = vpop.permute.xlu1 %70  ;;  %v61_v32 = vpop.permute.xlu0 %60 }
  0xa1   :  { %v81_v33 = vpop.permute.xlu1 %80  ;;  %v76_v34 = vpop.permute.xlu0 %75 }
  0xa7   :  { %v91_v43 = vpop.permute.xlu1 %90  ;;  %v86_v44 = vpop.permute.xlu0 %85 }
  0xf9   :  { %v298_v35 = vpop.f32.mrb[0].mxu0  ;;  %v304_v36 = vpop.f32.mrb[0].mxu1 }
  0xfa   :  { %v190_v37 = vadd.f32 %v298_v35, %v61_v32  ;;  %v210_v38 = vadd.f32 %v304_v36, %v81_v33  ;;  %v184_v39 = vpop.f32.mrb[1].mxu0  ;;  %v204_v40 = vpop.f32.mrb[1].mxu1 }
  0xfb   :  { %v185_v41 = vadd.f32 %v184_v39, %v56_v30  ;;  %v205_v42 = vadd.f32 %v204_v40, %v76_v34 }
  0xfc   :  { %v224_v45 = vmax.f32 %v190_v37, 0.0  ;;  %v228_v46 = vmax.f32 %v210_v38, 0.0 }
  0xfd   :  { %v223_v47 = vmax.f32 %v185_v41, 0.0  ;;  %v227_v48 = vmax.f32 %v205_v42, 0.0  ;;  %v301_v49 = vpop.f32.mrb[2].mxu0  ;;  %v307_v50 = vpop.f32.mrb[2].mxu1 }
  0xfe   :  { %232 = vst [vmem:[#allocation5 + $0x8] sm:$0xff] %v224_v45  ;;  %236 = vst [vmem:[#allocation5 + $0x28] sm:$0xff] %v228_v46  ;;  %v200_v51 = vadd.f32 %v301_v49, %v71_v31  ;;  %v220_v52 = vadd.f32 %v307_v50, %v91_v43  ;;  %v194_v53 = vpop.f32.mrb[3].mxu0  ;;  %v214_v54 = vpop.f32.mrb[3].mxu1 }
  0xff   :  { %231 = vst [vmem:[#allocation5] sm:$0xff] %v223_v47  ;;  %235 = vst [vmem:[#allocation5 + $0x20] sm:$0xff] %v227_v48  ;;  %v195_v55 = vadd.f32 %v194_v53, %v66_v29  ;;  %v215_v56 = vadd.f32 %v214_v54, %v86_v44 }
 0x100   :  { %v226_v57 = vmax.f32 %v200_v51, 0.0  ;;  %v230_v58 = vmax.f32 %v220_v52, 0.0 }
 0x101   :  { %v225_v59 = vmax.f32 %v195_v55, 0.0  ;;  %v229_v60 = vmax.f32 %v215_v56, 0.0 }
 0x102   :  { %234 = vst [vmem:[#allocation5 + $0x18] sm:$0xff] %v226_v57  ;;  %238 = vst [vmem:[#allocation5 + $0x38] sm:$0xff] %v230_v58 }
 0x103   :  { %233 = vst [vmem:[#allocation5 + $0x10] sm:$0xff] %v225_v59  ;;  %237 = vst [vmem:[#allocation5 + $0x30] sm:$0xff] %v229_v60 }
 0x104   :  { %372 = shalt.err (!%p369_p12)
}
 0x105   :  { %s373_s7 = scalar_lea.hbm %s501_s3, 1024 }
 0x106   :  { %p374_p13 = scmp.ne.s32.totalorder %s501_s3, %s373_s7  ;;  %p377_p0 = scmp.lt.u32.totalorder %s373_s7, %s501_s3 }
 0x108   :  { %p379_p1 = pnand %p377_p0, %p374_p13 }
 0x10a   :  { %382 = shalt.err (!%p379_p1)
}
 0x10b   :  { %250 = dma.vmem_to_hbm [thread:$0]  %s245_s1, 1024, %s501_s3, [#allocation4], %s388_s22, %s388_s22, %s389_s23  }
 0x10c   :  { %385 = dma.done.wait [#allocation4], 1024  }
 0x10d   :  { %386 = vsyncadd [#allocation4], 4294966272 }
 0x10e   :  { %254 = vsyncpa [#allocation3], 1 }
 0x10f   :  { %255 = vsyncpa [#allocation4], 1 }

</bundles_post_ra>
